<compile_context>
chip_gen: v7x
topology: tpu7x:2x2x1
jax: 0.10.0
libtpu: 0.0.40
codegen_flags: <defaults>
</compile_context>

<pallas_src>
import numpy as np
import jax
import jax.numpy as jnp
from jax import lax
from jax.experimental import pallas as pl
from jax.experimental.pallas import tpu as pltpu

SEED = 47
STATE_SIZE = 32
SIZE1 = 256
SIZE2 = 128 * 2   # 256
SIZE3 = 64 * 2    # 128
NEG_SLOPE = 0.01  # F.leaky_relu default
MAX_TB = 2048     # max batch rows (lanes) per grid step

assert SIZE1 == SIZE2  # scratch buffer is reused for layer-1 and layer-2 outputs


def _leaky_relu(v):
    # 2 VALU ops (mul + max) instead of cmp + mul + select.
    return jnp.maximum(v, NEG_SLOPE * v)


def critic_ppo_kernel(x_ref, w1_ref, w2_ref, w3_ref, w4_ref, b4_ref,
                      o_ref, h_ref):
    """One batch tile (tb rows of x). Activations are (features, tb)."""
    f32 = jnp.float32
    bf16 = jnp.bfloat16

    # dense1: (SIZE1, S) . (tb, S) contracted on S -> (SIZE1, tb).
    # x arrives in native (tb, S) f32 layout; cast + transpose handled in-kernel.
    h_ref[...] = _leaky_relu(
        lax.dot_general(w1_ref[...], x_ref[...].astype(bf16),
                        dimension_numbers=(((1,), (1,)), ((), ())),
                        preferred_element_type=f32)
    ).astype(bf16)
    # dense2: (SIZE2, SIZE1) @ (SIZE1, tb) -> (SIZE2, tb)
    h_ref[...] = _leaky_relu(
        jnp.dot(w2_ref[...], h_ref[...], preferred_element_type=f32)
    ).astype(bf16)
    # dense3: (SIZE3, SIZE2) @ (SIZE2, tb) -> (SIZE3, tb)
    h3 = _leaky_relu(
        jnp.dot(w3_ref[...], h_ref[...], preferred_element_type=f32)
    ).astype(bf16)
    # dense4 (128 -> 1) on the MXU: (1, SIZE3) @ (SIZE3, tb) -> (1, tb),
    # bias read as a scalar from SMEM.  Output tile is lane-dense.
    v = jnp.dot(w4_ref[...], h3, preferred_element_type=f32)
    o_ref[...] = (v + b4_ref[0, 0])[None].astype(o_ref.dtype)   # (1, 1, tb)


def _round_up(n, m):
    return (n + m - 1) // m * m


def _choose_tiling(B, max_tb=MAX_TB):
    """Pick (G, tb): tb multiple of 128, tb <= max_tb, and G >= 2 when B allows
    so both TensorCores on v7x get work."""
    Bp = _round_up(B, 128)
    G = max(2 if Bp >= 256 else 1, pl.cdiv(Bp, max_tb))
    tb = _round_up(pl.cdiv(Bp, G), 128)
    return G, tb


def critic_ppo_forward(x, w1, w2, w3, w4, b4, *, max_tb=MAX_TB):
    """x: (B, state_size) f32. Weights in torch layout (out, in). Returns (B, 1) f32."""
    B, S = x.shape
    G, tb = _choose_tiling(B, max_tb)
    B_pad = G * tb

    # Single (conditional) pad; x stays in native (B, S) f32 layout — cast and
    # transpose happen inside the kernel.
    x_in = x if B_pad == B else jnp.pad(x, ((0, B_pad - B), (0, 0)))
    w1b = w1.astype(jnp.bfloat16)                      # (SIZE1, S)
    w2b = w2.astype(jnp.bfloat16)                      # (SIZE2, SIZE1)
    w3b = w3.astype(jnp.bfloat16)                      # (SIZE3, SIZE2)
    w4b = w4.reshape(1, SIZE3).astype(jnp.bfloat16)    # (1, SIZE3), lane-dense
    b4s = b4.reshape(1, 1).astype(jnp.float32)         # scalar -> SMEM

    flops = 2 * B_pad * (S * SIZE1 + SIZE1 * SIZE2 + SIZE2 * SIZE3 + SIZE3)
    bytes_accessed = (4 * x_in.size
                      + 2 * (w1b.size + w2b.size + w3b.size + w4b.size)
                      + 4 + 4 * B_pad)

    out = pl.pallas_call(
        critic_ppo_kernel,
        out_shape=jax.ShapeDtypeStruct((G, 1, tb), jnp.float32),
        grid_spec=pltpu.PrefetchScalarGridSpec(
            num_scalar_prefetch=0,
            grid=(G,),
            in_specs=[
                pl.BlockSpec((tb, S), lambda i: (i, 0)),            # x batch tile (native layout)
                pl.BlockSpec((SIZE1, S), lambda i: (0, 0)),         # w1 (resident)
                pl.BlockSpec((SIZE2, SIZE1), lambda i: (0, 0)),     # w2 (resident)
                pl.BlockSpec((SIZE3, SIZE2), lambda i: (0, 0)),     # w3 (resident)
                pl.BlockSpec((1, SIZE3), lambda i: (0, 0)),         # w4 (resident, lane-dense)
                pl.BlockSpec(memory_space=pltpu.MemorySpace.SMEM),  # b4 scalar
            ],
            out_specs=pl.BlockSpec((1, 1, tb), lambda i: (i, 0, 0)),
            scratch_shapes=[pltpu.VMEM((SIZE1, tb), jnp.bfloat16)],
        ),
        compiler_params=pltpu.CompilerParams(
            dimension_semantics=("parallel",),
            vmem_limit_bytes=32 * 1024 * 1024),
        cost_estimate=pl.CostEstimate(
            flops=flops, transcendentals=0, bytes_accessed=bytes_accessed),
    )(x_in, w1b, w2b, w3b, w4b, b4s)

    return out.reshape(B_pad, 1)[:B]


def init_params(key, state_size=STATE_SIZE):
    """Deterministic init mirroring Critic_PPO.reset_parameters().

    hidden_init() in the reference uses weight.size()[0] == out_features as
    'fan_in' (a quirk of that code); we reproduce the same limits.
    Weights are kept in torch layout (out_features, in_features).
    """
    k1, k2, k3, k4, k5 = jax.random.split(key, 5)

    def uni(k, shape, lim):
        return jax.random.uniform(k, shape, jnp.float32, minval=-lim, maxval=lim)

    w1 = uni(k1, (SIZE1, state_size), 1.0 / np.sqrt(SIZE1))
    w2 = uni(k2, (SIZE2, SIZE1), 1.0 / np.sqrt(SIZE2))
    w3 = uni(k3, (SIZE3, SIZE2), 1.0 / np.sqrt(SIZE3))
    w4 = uni(k4, (1, SIZE3), 0.003)
    # dense4.bias keeps torch's default Linear init: U(-1/sqrt(in), 1/sqrt(in))
    b4 = uni(k5, (1,), 1.0 / np.sqrt(SIZE3))
    return w1, w2, w3, w4, b4


def reference_forward(x, w1, w2, w3, w4, b4):
    """Pure-JAX reference with the same bf16-in / f32-accumulate precision."""
    f32, bf16 = jnp.float32, jnp.bfloat16
    h = _leaky_relu(jnp.dot(x.astype(bf16), w1.astype(bf16).T,
                            preferred_element_type=f32))
    h = _leaky_relu(jnp.dot(h.astype(bf16), w2.astype(bf16).T,
                            preferred_element_type=f32))
    h = _leaky_relu(jnp.dot(h.astype(bf16), w3.astype(bf16).T,
                            preferred_element_type=f32))
    return (jnp.dot(h.astype(bf16), w4.astype(bf16).T,
                    preferred_element_type=f32) + b4.reshape(1, 1))


if __name__ == "__main__":
    key = jax.random.PRNGKey(0)
    kx, kp = jax.random.split(key)

    B = 8
    x = jax.random.normal(kx, (B, STATE_SIZE), dtype=jnp.float32)
    params = init_params(kp)

    out = critic_ppo_forward(x, *params)
    out = jax.block_until_ready(out)

    ref = reference_forward(x, *params)
    assert out.shape == (B, 1), out.shape
    np.testing.assert_allclose(np.asarray(out), np.asarray(ref),
                               rtol=1e-3, atol=1e-3)

    print("KERNEL_OK")
</pallas_src>

<mosaic_0001>
module attributes {stable_mosaic.version = 11 : i64} {
  func.func @critic_ppo_kernel(%arg0: i32, %arg1: memref<128x32xf32, #tpu.memory_space<vmem>>, %arg2: memref<256x32xbf16, #tpu.memory_space<vmem>>, %arg3: memref<256x256xbf16, #tpu.memory_space<vmem>>, %arg4: memref<128x256xbf16, #tpu.memory_space<vmem>>, %arg5: memref<1x128xbf16, #tpu.memory_space<vmem>>, %arg6: memref<1x1xf32, #tpu.memory_space<smem>>, %arg7: memref<1x1x128xf32, #tpu.memory_space<vmem>>, %arg8: memref<256x128xbf16, #tpu.memory_space<vmem>>) attributes {dimension_semantics = [#tpu.dimension_semantics<parallel>], iteration_bounds = array<i64: 1>, scalar_prefetch = 0 : i64, scratch_operands = 1 : i64, tpu.core_type = #tpu.core_type<tc>, window_params = [{transform_indices = @transform_0, window_bounds = array<i64: 128, 32>}, {pipeline_mode = #tpu.pipeline_mode<synchronous>, transform_indices = @transform_1, window_bounds = array<i64: 256, 32>}, {pipeline_mode = #tpu.pipeline_mode<synchronous>, transform_indices = @transform_2, window_bounds = array<i64: 256, 256>}, {pipeline_mode = #tpu.pipeline_mode<synchronous>, transform_indices = @transform_3, window_bounds = array<i64: 128, 256>}, {pipeline_mode = #tpu.pipeline_mode<synchronous>, transform_indices = @transform_4, window_bounds = array<i64: 1, 128>}, {transform_indices = @transform_5, window_bounds = array<i64: 1, 1>}, {transform_indices = @transform_6, window_bounds = array<i64: 1, 1, 128>}]} {
    %c0 = arith.constant 0 : index
    %c0_0 = arith.constant 0 : index
    %0 = vector.load %arg2[%c0, %c0_0] : memref<256x32xbf16, #tpu.memory_space<vmem>>, vector<256x32xbf16>
    %c0_1 = arith.constant 0 : index
    %c0_2 = arith.constant 0 : index
    %1 = vector.load %arg1[%c0_1, %c0_2] : memref<128x32xf32, #tpu.memory_space<vmem>>, vector<128x32xf32>
    %2 = arith.truncf %1 : vector<128x32xf32> to vector<128x32xbf16>
    %cst = arith.constant dense<0.000000e+00> : vector<256x128xf32>
    %3 = tpu.matmul %0, %2, %cst {dimension_numbers = #tpu.dot_dimension_numbers<[1], [1], [0], [0], [0, 0, 1, 0], [], []>} : vector<256x32xbf16>, vector<128x32xbf16>, vector<256x128xf32> -> vector<256x128xf32>
    %cst_3 = arith.constant 0.00999999977 : f32
    %4 = vector.broadcast %cst_3 : f32 to vector<256x128xf32>
    %5 = arith.mulf %4, %3 : vector<256x128xf32>
    %6 = arith.maximumf %3, %5 : vector<256x128xf32>
    %7 = arith.truncf %6 : vector<256x128xf32> to vector<256x128xbf16>
    %c0_4 = arith.constant 0 : index
    %c0_5 = arith.constant 0 : index
    %8 = vector.load %arg8[%c0_4, %c0_5] : memref<256x128xbf16, #tpu.memory_space<vmem>>, vector<256x128xbf16>
    tpu.vector_store %arg8[%c0_4, %c0_5], %7 {strides = array<i32>} : memref<256x128xbf16, #tpu.memory_space<vmem>>, vector<256x128xbf16>,
    %c0_6 = arith.constant 0 : index
    %c0_7 = arith.constant 0 : index
    %9 = vector.load %arg3[%c0_6, %c0_7] : memref<256x256xbf16, #tpu.memory_space<vmem>>, vector<256x256xbf16>
    %c0_8 = arith.constant 0 : index
    %c0_9 = arith.constant 0 : index
    %10 = vector.load %arg8[%c0_8, %c0_9] : memref<256x128xbf16, #tpu.memory_space<vmem>>, vector<256x128xbf16>
    %cst_10 = arith.constant dense<0.000000e+00> : vector<256x128xf32>
    %11 = tpu.matmul %9, %10, %cst_10 {dimension_numbers = #tpu.dot_dimension_numbers<[1], [0], [0], [1], [0, 0, 1, 1], [], []>} : vector<256x256xbf16>, vector<256x128xbf16>, vector<256x128xf32> -> vector<256x128xf32>
    %cst_11 = arith.constant 0.00999999977 : f32
    %12 = vector.broadcast %cst_11 : f32 to vector<256x128xf32>
    %13 = arith.mulf %12, %11 : vector<256x128xf32>
    %14 = arith.maximumf %11, %13 : vector<256x128xf32>
    %15 = arith.truncf %14 : vector<256x128xf32> to vector<256x128xbf16>
    %c0_12 = arith.constant 0 : index
    %c0_13 = arith.constant 0 : index
    %16 = vector.load %arg8[%c0_12, %c0_13] : memref<256x128xbf16, #tpu.memory_space<vmem>>, vector<256x128xbf16>
    tpu.vector_store %arg8[%c0_12, %c0_13], %15 {strides = array<i32>} : memref<256x128xbf16, #tpu.memory_space<vmem>>, vector<256x128xbf16>,
    %c0_14 = arith.constant 0 : index
    %c0_15 = arith.constant 0 : index
    %17 = vector.load %arg4[%c0_14, %c0_15] : memref<128x256xbf16, #tpu.memory_space<vmem>>, vector<128x256xbf16>
    %c0_16 = arith.constant 0 : index
    %c0_17 = arith.constant 0 : index
    %18 = vector.load %arg8[%c0_16, %c0_17] : memref<256x128xbf16, #tpu.memory_space<vmem>>, vector<256x128xbf16>
    %cst_18 = arith.constant dense<0.000000e+00> : vector<128x128xf32>
    %19 = tpu.matmul %17, %18, %cst_18 {dimension_numbers = #tpu.dot_dimension_numbers<[1], [0], [0], [1], [0, 0, 1, 1], [], []>} : vector<128x256xbf16>, vector<256x128xbf16>, vector<128x128xf32> -> vector<128x128xf32>
    %cst_19 = arith.constant 0.00999999977 : f32
    %20 = vector.broadcast %cst_19 : f32 to vector<128x128xf32>
    %21 = arith.mulf %20, %19 : vector<128x128xf32>
    %22 = arith.maximumf %19, %21 : vector<128x128xf32>
    %23 = arith.truncf %22 : vector<128x128xf32> to vector<128x128xbf16>
    %c0_20 = arith.constant 0 : index
    %c0_21 = arith.constant 0 : index
    %24 = vector.load %arg5[%c0_20, %c0_21] : memref<1x128xbf16, #tpu.memory_space<vmem>>, vector<1x128xbf16>
    %cst_22 = arith.constant dense<0.000000e+00> : vector<1x128xf32>
    %25 = tpu.matmul %24, %23, %cst_22 {dimension_numbers = #tpu.dot_dimension_numbers<[1], [0], [0], [1], [0, 0, 1, 1], [], []>} : vector<1x128xbf16>, vector<128x128xbf16>, vector<1x128xf32> -> vector<1x128xf32>
    %c0_23 = arith.constant 0 : index
    %c0_24 = arith.constant 0 : index
    %26 = memref.load %arg6[%c0_23, %c0_24] : memref<1x1xf32, #tpu.memory_space<smem>>
    %27 = vector.broadcast %26 : f32 to vector<1x128xf32>
    %28 = arith.addf %25, %27 : vector<1x128xf32>
    %29 = vector.shape_cast %28 : vector<1x128xf32> to vector<1x1x128xf32>
    %c0_25 = arith.constant 0 : index
    %c0_26 = arith.constant 0 : index
    %c0_27 = arith.constant 0 : index
    %30 = vector.load %arg7[%c0_25, %c0_26, %c0_27] : memref<1x1x128xf32, #tpu.memory_space<vmem>>, vector<1x1x128xf32>
    tpu.vector_store %arg7[%c0_25, %c0_26, %c0_27], %29 {strides = array<i32>} : memref<1x1x128xf32, #tpu.memory_space<vmem>>, vector<1x1x128xf32>,
    return
  }
  func.func @transform_0(%arg0: i32) -> (i32, i32) {
    %c0_i32 = arith.constant 0 : i32
    %c0_i32_0 = arith.constant 0 : i32
    return %arg0, %c0_i32 : i32, i32
  }
  func.func @transform_1(%arg0: i32) -> (i32, i32) {
    %c0_i32 = arith.constant 0 : i32
    %c0_i32_0 = arith.constant 0 : i32
    %c0_i32_1 = arith.constant 0 : i32
    return %c0_i32, %c0_i32_0 : i32, i32
  }
  func.func @transform_2(%arg0: i32) -> (i32, i32) {
    %c0_i32 = arith.constant 0 : i32
    %c0_i32_0 = arith.constant 0 : i32
    %c0_i32_1 = arith.constant 0 : i32
    return %c0_i32, %c0_i32_0 : i32, i32
  }
  func.func @transform_3(%arg0: i32) -> (i32, i32) {
    %c0_i32 = arith.constant 0 : i32
    %c0_i32_0 = arith.constant 0 : i32
    %c0_i32_1 = arith.constant 0 : i32
    return %c0_i32, %c0_i32_0 : i32, i32
  }
  func.func @transform_4(%arg0: i32) -> (i32, i32) {
    %c0_i32 = arith.constant 0 : i32
    %c0_i32_0 = arith.constant 0 : i32
    %c0_i32_1 = arith.constant 0 : i32
    return %c0_i32, %c0_i32_0 : i32, i32
  }
  func.func @transform_5(%arg0: i32) -> (i32, i32) {
    %c0_i32 = arith.constant 0 : i32
    %c0_i32_0 = arith.constant 0 : i32
    %c0_i32_1 = arith.constant 0 : i32
    return %c0_i32, %c0_i32_0 : i32, i32
  }
  func.func @transform_6(%arg0: i32) -> (i32, i32, i32) {
    %c0_i32 = arith.constant 0 : i32
    %c0_i32_0 = arith.constant 0 : i32
    %c0_i32_1 = arith.constant 0 : i32
    return %arg0, %c0_i32, %c0_i32_0 : i32, i32, i32
  }
}

</mosaic_0001>

<bundles_post_ra>
// kernel: tpu_custom_call.1
= control target key start
LH: loop header
LB: loop body
LE: loop exit
PB: predicated region body
PF: predicated region fallthrough
CT: control target
= control target key end

     0   :  { %12 = vsyncpa [#allocation5], 0  ;;  %s2138_s0 = inlined_call_operand.vmem [shape: f32[128,32], index: 0, kind: input, shape index: {}]   ;;  %s2139_s1 = inlined_call_operand.vmem [shape: bf16[256,32], index: 1, kind: input, shape index: {}]   ;;  %s2140_s2 = inlined_call_operand.vmem [shape: bf16[256,256], index: 2, kind: input, shape index: {}]   ;;  %s2141_s3 = inlined_call_operand.hbm [shape: bf16[128,256], index: 3, kind: input, shape index: {}]   ;;  %s2142_s4 = inlined_call_operand.vmem [shape: bf16[1,128], index: 4, kind: input, shape index: {}]   ;;  %s2143_s5 = inlined_call_operand.<no memory space> [shape: f32[1,1], index: 5, kind: input, shape index: {}]   ;;  %s2144_s6 = inlined_call_operand.hbm [shape: f32[1,1,128], index: 6, kind: output, shape index: {}]  }
   0x1   :  { %13 = vsyncpa [#allocation6], 0  ;;  %s1786_s21 = smov [#allocation4]   ;;  %s1738_s25 = scalar_lea.hbm %s2141_s3, 2048 }
   0x2   :  { %s25_s22 = sshll.u32 %s1786_s21, 4  ;;  %p1739_p0 = scmp.ne.s32.totalorder %s2141_s3, %s1738_s25  ;;  %s26_s22 = int_to_ptr.vmem [resolvable:$true] %s25_s22 }
   0x3   :  { %p1742_p1 = scmp.lt.u32.totalorder %s1738_s25, %s2141_s3 }
   0x5   :  { %p1744_p2 = pnand %p1742_p1, %p1739_p0 }
   0x7   :  { %1747 = shalt.err (!%p1744_p2)
}
   0x8   :  { %s1748_s30 = scalar_lea.vmem %s26_s22, 2048  ;;  %p1753_p4 = scmp.lt.s32.totalorder %s26_s22, %s26_s22 }
   0x9   :  { %p1749_p3 = scmp.ne.s32.totalorder %s26_s22, %s1748_s30  ;;  %p1754_p5 = scmp.lt.s32.totalorder %s1748_s30, %s1748_s30 }
   0xb   :  { %p1755_p6 = por %p1754_p5, %p1753_p4 }
   0xd   :  { %p1756_p7 = pnand %p1755_p6, %p1749_p3 }
   0xf   :  { %1759 = shalt.err (!%p1756_p7)
}
  0x10   :  { %s1787_s7 = smov 128   ;;  %s1788_s8 = smov 8  }
  0x11   :  { %31 = dma.hbm_to_vmem [thread:$0]  %s2141_s3, 2048, %s26_s22, [#allocation5], %s1787_s7, %s1787_s7, %s1788_s8  }
  0x12   :  { %1782 = dma.done.wait [#allocation5], 2048  }
  0x13   :  { %1783 = vsyncadd [#allocation5], 4294965248  ;;  %v72_v0 = vld [vmem:[%s2138_s0] sm:$0xff]  ;;  %v73_v1 = vld [vmem:[%s2138_s0 + $0x8] sm:$0xff]  ;;  %vm176_vm0 = vcmask 261120   ;;  %vm1790_vm1 = vmmov 0  }
  0x14   :  { %v74_v2 = vld [vmem:[%s2138_s0 + $0x10] sm:$0xff]  ;;  %v88_v3 = vpack.c.bf16 %v73_v1, %v72_v0  ;;  %v75_v4 = vld [vmem:[%s2138_s0 + $0x18] sm:$0xff]  ;;  %v76_v7 = vld [vmem:[%s2138_s0 + $0x20] sm:$0xff]  ;;  %s1791_s10 = smov [#allocation7]  }
  0x15   :  { %v89_v5 = vpack.c.bf16 %v75_v4, %v74_v2  ;;  %v77_v8 = vld [vmem:[%s2138_s0 + $0x28] sm:$0xff]  ;;  %v1650_v9 = vld [vmem:[%s2139_s1] sm:$0xff]   ;;  %v78_v12 = vld [vmem:[%s2138_s0 + $0x30] sm:$0xff]  ;;  %s1270_s11 = sshll.u32 %s1791_s10, 4  ;;  %s1271_s11 = int_to_ptr.vmem [resolvable:$true] %s1270_s11 }
  0x16   :  { %1636 = vmatprep.subr.msk.bf16.mxu0 %vm176_vm0, %v88_v3  ;;  %v226_v6 = vsel %vm176_vm0, %v88_v3, 0  ;;  %1584 = vmatprep.mubr.msk.bf16.mxu0 %vm176_vm0, %v1650_v9  ;;  %v90_v11 = vpack.c.bf16 %v77_v8, %v76_v7  ;;  %v79_v13 = vld [vmem:[%s2138_s0 + $0x38] sm:$0xff]  ;;  %v80_v16 = vld [vmem:[%s2138_s0 + $0x40] sm:$0xff]  ;;  %v81_v17 = vld [vmem:[%s2138_s0 + $0x48] sm:$0xff]  ;;  %s1760_s12 = scalar_lea.vmem %s1271_s11, 16  ;;  %s1764_s13 = scalar_lea.vmem %s1271_s11, 32 }
  0x17   :  { %1569 = vmatpush3.bf16.xpose.msra.mxu0 %v226_v6  ;;  %v229_v10 = vsel %vm176_vm0, %v89_v5, 0  ;;  %v91_v15 = vpack.c.bf16 %v79_v13, %v78_v12  ;;  %v92_v19 = vpack.c.bf16 %v81_v17, %v80_v16  ;;  %v82_v20 = vld [vmem:[%s2138_s0 + $0x50] sm:$0xff]  ;;  %v83_v21 = vld [vmem:[%s2138_s0 + $0x58] sm:$0xff]  ;;  %v84_v24 = vld [vmem:[%s2138_s0 + $0x60] sm:$0xff]  ;;  %p1761_p8 = scmp.ne.s32.totalorder %s1271_s11, %s1760_s12  ;;  %p1765_p9 = scmp.lt.s32.totalorder %s1271_s11, %s1271_s11 }
  0x18   :  { %1637 = vmatprep.subr.msk.bf16.mxu0 %vm176_vm0, %v89_v5  ;;  %v232_v14 = vsel %vm176_vm0, %v90_v11, 0  ;;  %v93_v23 = vpack.c.bf16 %v83_v21, %v82_v20  ;;  %v85_v25 = vld [vmem:[%s2138_s0 + $0x68] sm:$0xff]  ;;  %v86_v28 = vld [vmem:[%s2138_s0 + $0x70] sm:$0xff]  ;;  %v87_v29 = vld [vmem:[%s2138_s0 + $0x78] sm:$0xff]  ;;  %p1766_p10 = scmp.lt.s32.totalorder %s1764_s13, %s1760_s12 }
  0x19   :  { %v235_v18 = vsel %vm176_vm0, %v91_v15, 0  ;;  %v238_v22 = vsel %vm176_vm0, %v92_v19, 0  ;;  %v94_v27 = vpack.c.bf16 %v85_v25, %v84_v24  ;;  %v95_v31 = vpack.c.bf16 %v87_v29, %v86_v28  ;;  %v1651_v33 = vld [vmem:[%s2139_s1 + $0x8] sm:$0xff]   ;;  %v1652_v34 = vld [vmem:[%s2139_s1 + $0x10] sm:$0xff]   ;;  %v1653_v35 = vld [vmem:[%s2139_s1 + $0x18] sm:$0xff]  }
  0x1a   :  { %v241_v26 = vsel %vm176_vm0, %v93_v23, 0  ;;  %v1654_v36 = vld [vmem:[%s2139_s1 + $0x20] sm:$0xff]   ;;  %v1655_v37 = vld [vmem:[%s2139_s1 + $0x28] sm:$0xff]   ;;  %v1656_v38 = vld [vmem:[%s2139_s1 + $0x30] sm:$0xff]   ;;  %p1767_p11 = por %p1766_p10, %p1765_p9 }
  0x1b   :  { %v244_v30 = vsel %vm176_vm0, %v94_v27, 0  ;;  %v247_v32 = vsel %vm176_vm0, %v95_v31, 0  ;;  %v1657_v39 = vld [vmem:[%s2139_s1 + $0x38] sm:$0xff]   ;;  %v1658_v40 = vld [vmem:[%s2139_s1 + $0x40] sm:$0xff]   ;;  %v1659_v41 = vld [vmem:[%s2139_s1 + $0x48] sm:$0xff]  }
  0x1c   :  { %v1660_v42 = vld [vmem:[%s2139_s1 + $0x50] sm:$0xff]   ;;  %v1661_v43 = vld [vmem:[%s2139_s1 + $0x58] sm:$0xff]   ;;  %v1662_v44 = vld [vmem:[%s2139_s1 + $0x60] sm:$0xff]   ;;  %p1768_p12 = pnand %p1767_p11, %p1761_p8 }
  0x1d   :  { %v1663_v45 = vld [vmem:[%s2139_s1 + $0x68] sm:$0xff]   ;;  %v1664_v46 = vld [vmem:[%s2139_s1 + $0x70] sm:$0xff]   ;;  %v1665_v47 = vld [vmem:[%s2139_s1 + $0x78] sm:$0xff]  }
  0x1e   :  { %v1668_v48 = vld [vmem:[%s2140_s2 + $0x4] ss:$8 sps:$4 sm:$0xff]  }
  0x1f   :  { %1571 = vmatpush3.bf16.xpose.msra.mxu0 %v229_v10  ;;  %746 = vmatprep.mubr.bf16.mxu1 %v1668_v48 }
  0x20   :  { %1638 = vmatprep.subr.msk.bf16.mxu0 %vm176_vm0, %v90_v11 }
  0x27   :  { %1573 = vmatpush3.bf16.xpose.msra.mxu0 %v232_v14 }
  0x28   :  { %1639 = vmatprep.subr.msk.bf16.mxu0 %vm176_vm0, %v91_v15 }
  0x2f   :  { %1575 = vmatpush3.bf16.xpose.msra.mxu0 %v235_v18 }
  0x30   :  { %1640 = vmatprep.subr.msk.bf16.mxu0 %vm176_vm0, %v92_v19 }
  0x37   :  { %1577 = vmatpush3.bf16.xpose.msra.mxu0 %v238_v22 }
  0x38   :  { %1641 = vmatprep.subr.msk.bf16.mxu0 %vm176_vm0, %v93_v23 }
  0x3f   :  { %1579 = vmatpush3.bf16.xpose.msra.mxu0 %v241_v26 }
  0x40   :  { %1642 = vmatprep.subr.msk.bf16.mxu0 %vm176_vm0, %v94_v27 }
  0x47   :  { %1581 = vmatpush3.bf16.xpose.msra.mxu0 %v244_v30 }
  0x48   :  { %1643 = vmatprep.subr.msk.bf16.mxu0 %vm176_vm0, %v95_v31 }
  0x4f   :  { %1583 = vmatpush3.bf16.xpose.msra.mxu0 %v247_v32 }
  0x56   :  { %1585 = vmatmul.mubr.msk.bf16.vlgmr.msra.gmra.mrb[0].mxu0 %vm176_vm0, %v1651_v33 }
  0x57   :  { %1588 = vmatprep.mubr.msk.bf16.mxu0 %vm176_vm0, %v1652_v34 }
  0x5e   :  { %1589 = vmatmul.mubr.msk.bf16.gmra.mrb[4].mxu0 %vm176_vm0, %v1653_v35 }
  0x5f   :  { %1592 = vmatprep.mubr.msk.bf16.mxu0 %vm176_vm0, %v1654_v36 }
  0x66   :  { %1593 = vmatmul.mubr.msk.bf16.gmra.mrb[8].mxu0 %vm176_vm0, %v1655_v37 }
  0x67   :  { %1596 = vmatprep.mubr.msk.bf16.mxu0 %vm176_vm0, %v1656_v38 }
  0x6e   :  { %1597 = vmatmul.mubr.msk.bf16.gmra.mrb[12].mxu0 %vm176_vm0, %v1657_v39 }
  0x6f   :  { %1600 = vmatprep.mubr.msk.bf16.mxu0 %vm176_vm0, %v1658_v40 }
  0x76   :  { %1601 = vmatmul.mubr.msk.bf16.gmra.mrb[16].mxu0 %vm176_vm0, %v1659_v41 }
  0x77   :  { %1604 = vmatprep.mubr.msk.bf16.mxu0 %vm176_vm0, %v1660_v42 }
  0x7e   :  { %1605 = vmatmul.mubr.msk.bf16.gmra.mrb[20].mxu0 %vm176_vm0, %v1661_v43 }
  0x7f   :  { %1608 = vmatprep.mubr.msk.bf16.mxu0 %vm176_vm0, %v1662_v44 }
  0x86   :  { %1609 = vmatmul.mubr.msk.bf16.gmra.mrb[24].mxu0 %vm176_vm0, %v1663_v45 }
  0x87   :  { %1612 = vmatprep.mubr.msk.bf16.mxu0 %vm176_vm0, %v1664_v46 }
  0x8e   :  { %1613 = vmatmul.mubr.msk.bf16.gmra.mrb[28].mxu0 %vm176_vm0, %v1665_v47 }
 0x129   :  { %v1586_v49 = vpop.f32.mrb[0].mxu0 }
 0x12a   :  { %v412_v50 = vmul.f32 0.01, %v1586_v49  ;;  %v283_v51 = vpop.f32.mrb[1].mxu0 }
 0x12b   :  { %v410_v52 = vmul.f32 0.01, %v283_v51  ;;  %v1587_v53 = vpop.f32.mrb[2].mxu0 }
 0x12c   :  { %v413_v54 = vmul.f32 0.01, %v1587_v53  ;;  %v286_v55 = vpop.f32.mrb[3].mxu0  ;;  %v444_v57 = vmax.f32 %v1586_v49, %v412_v50 }
 0x12d   :  { %v411_v56 = vmul.f32 0.01, %v286_v55  ;;  %v442_v59 = vmax.f32 %v283_v51, %v410_v52 }
 0x12e   :  { %v445_v58 = vmax.f32 %v1587_v53, %v413_v54 }
 0x12f   :  { %v443_v60 = vmax.f32 %v286_v55, %v411_v56 }
 0x130   :  { %v1970_v61 = vpack.c.bf16 %v445_v58, %v444_v57 }
 0x131   :  { %v1590_v62 = vpop.f32.mrb[4].mxu0  ;;  %v1972_v63 = vpack.c.bf16 %v443_v60, %v442_v59 }
 0x132   :  { %v416_v0 = vmul.f32 0.01, %v1590_v62  ;;  %v299_v1 = vpop.f32.mrb[5].mxu0 }
 0x133   :  { %v414_v2 = vmul.f32 0.01, %v299_v1  ;;  %v1591_v3 = vpop.f32.mrb[6].mxu0 }
 0x134   :  { %v417_v4 = vmul.f32 0.01, %v1591_v3  ;;  %v302_v5 = vpop.f32.mrb[7].mxu0  ;;  %v448_v7 = vmax.f32 %v1590_v62, %v416_v0 }
 0x135   :  { %v415_v6 = vmul.f32 0.01, %v302_v5  ;;  %v446_v9 = vmax.f32 %v299_v1, %v414_v2 }
 0x136   :  { %v449_v8 = vmax.f32 %v1591_v3, %v417_v4 }
 0x137   :  { %v447_v10 = vmax.f32 %v302_v5, %v415_v6 }
 0x138   :  { %v1974_v11 = vpack.c.bf16 %v449_v8, %v448_v7 }
 0x139   :  { %v1976_v12 = vpack.c.bf16 %v447_v10, %v446_v9  ;;  %v1594_v13 = vpop.f32.mrb[8].mxu0 }
 0x13a   :  { %v420_v14 = vmul.f32 0.01, %v1594_v13  ;;  %v315_v15 = vpop.f32.mrb[9].mxu0 }
 0x13b   :  { %v418_v16 = vmul.f32 0.01, %v315_v15  ;;  %v1595_v17 = vpop.f32.mrb[10].mxu0 }
 0x13c   :  { %v421_v18 = vmul.f32 0.01, %v1595_v17  ;;  %v318_v19 = vpop.f32.mrb[11].mxu0  ;;  %v452_v21 = vmax.f32 %v1594_v13, %v420_v14 }
 0x13d   :  { %v419_v20 = vmul.f32 0.01, %v318_v19  ;;  %v450_v23 = vmax.f32 %v315_v15, %v418_v16 }
 0x13e   :  { %v453_v22 = vmax.f32 %v1595_v17, %v421_v18 }
 0x13f   :  { %v451_v24 = vmax.f32 %v318_v19, %v419_v20 }
 0x140   :  { %v1978_v25 = vpack.c.bf16 %v453_v22, %v452_v21 }
 0x141   :  { %v1980_v26 = vpack.c.bf16 %v451_v24, %v450_v23  ;;  %v1598_v27 = vpop.f32.mrb[12].mxu0 }
 0x142   :  { %v424_v28 = vmul.f32 0.01, %v1598_v27  ;;  %v331_v29 = vpop.f32.mrb[13].mxu0 }
 0x143   :  { %v422_v30 = vmul.f32 0.01, %v331_v29  ;;  %v1599_v31 = vpop.f32.mrb[14].mxu0 }
 0x144   :  { %v425_v32 = vmul.f32 0.01, %v1599_v31  ;;  %v334_v33 = vpop.f32.mrb[15].mxu0  ;;  %v456_v35 = vmax.f32 %v1598_v27, %v424_v28 }
 0x145   :  { %v423_v34 = vmul.f32 0.01, %v334_v33  ;;  %v454_v37 = vmax.f32 %v331_v29, %v422_v30 }
 0x146   :  { %v457_v36 = vmax.f32 %v1599_v31, %v425_v32 }
 0x147   :  { %v455_v38 = vmax.f32 %v334_v33, %v423_v34 }
 0x148   :  { %v1982_v39 = vpack.c.bf16 %v457_v36, %v456_v35  ;;  %v1666_v35 = vld [vmem:[%s2140_s2] ss:$8 sps:$4 sm:$0xff]   ;;  %v1672_v36 = vld [vmem:[%s2140_s2 + $0x24] ss:$8 sps:$4 sm:$0xff]  }
 0x149   :  { %v1984_v40 = vpack.c.bf16 %v455_v38, %v454_v37  ;;  %v1602_v41 = vpop.f32.mrb[16].mxu0  ;;  %v1674_v37 = vld [vmem:[%s2140_s2 + $0x20] ss:$8 sps:$4 sm:$0xff]   ;;  %v1675_v38 = vld [vmem:[%s2140_s2 + $0x34] ss:$8 sps:$4 sm:$0xff]  }
 0x14a   :  { %v428_v42 = vmul.f32 0.01, %v1602_v41  ;;  %v347_v43 = vpop.f32.mrb[17].mxu0 }
 0x14b   :  { %v426_v44 = vmul.f32 0.01, %v347_v43  ;;  %v1603_v45 = vpop.f32.mrb[18].mxu0 }
 0x14c   :  { %v429_v46 = vmul.f32 0.01, %v1603_v45  ;;  %v350_v47 = vpop.f32.mrb[19].mxu0  ;;  %v460_v49 = vmax.f32 %v1602_v41, %v428_v42  ;;  %v1680_v41 = vld [vmem:[%s2140_s2 + $0x40] ss:$8 sps:$4 sm:$0xff]  }
 0x14d   :  { %v427_v48 = vmul.f32 0.01, %v350_v47  ;;  %v458_v51 = vmax.f32 %v347_v43, %v426_v44  ;;  %v1681_v42 = vld [vmem:[%s2140_s2 + $0x54] ss:$8 sps:$4 sm:$0xff]   ;;  %v1683_v43 = vld [vmem:[%s2140_s2 + $0x50] ss:$8 sps:$4 sm:$0xff]  }
 0x14e   :  { %v461_v50 = vmax.f32 %v1603_v45, %v429_v46  ;;  %v1684_v44 = vld [vmem:[%s2140_s2 + $0x64] ss:$8 sps:$4 sm:$0xff]   ;;  %v1686_v45 = vld [vmem:[%s2140_s2 + $0x60] ss:$8 sps:$4 sm:$0xff]   ;;  %v1687_v46 = vld [vmem:[%s2140_s2 + $0x74] ss:$8 sps:$4 sm:$0xff]  }
 0x14f   :  { %v459_v52 = vmax.f32 %v350_v47, %v427_v48  ;;  %v1689_v47 = vld [vmem:[%s2140_s2 + $0x70] ss:$8 sps:$4 sm:$0xff]   ;;  %v1690_v48 = vld [vmem:[%s2140_s2 + $0x84] ss:$8 sps:$4 sm:$0xff]  }
 0x150   :  { %v483_v53 = vpack.c.bf16 %v461_v50, %v460_v49  ;;  %v1692_v49 = vld [vmem:[%s2140_s2 + $0x80] ss:$8 sps:$4 sm:$0xff]   ;;  %v1693_v50 = vld [vmem:[%s2140_s2 + $0x94] ss:$8 sps:$4 sm:$0xff]  }
 0x151   :  { %v1606_v54 = vpop.f32.mrb[20].mxu0  ;;  %v482_v55 = vpack.c.bf16 %v459_v52, %v458_v51  ;;  %v1695_v51 = vld [vmem:[%s2140_s2 + $0x90] ss:$8 sps:$4 sm:$0xff]   ;;  %v1696_v52 = vld [vmem:[%s2140_s2 + $0xa4] ss:$8 sps:$4 sm:$0xff]  }
 0x152   :  { %v432_v56 = vmul.f32 0.01, %v1606_v54  ;;  %v363_v57 = vpop.f32.mrb[21].mxu0 }
 0x153   :  { %v430_v58 = vmul.f32 0.01, %v363_v57  ;;  %v1607_v59 = vpop.f32.mrb[22].mxu0  ;;  %1383 = vmatprep.subr.bf16.mxu1 %v482_v55  ;;  %v1701_v55 = vld [vmem:[%s2140_s2 + $0xb0] ss:$8 sps:$4 sm:$0xff]  }
 0x154   :  { %v433_v60 = vmul.f32 0.01, %v1607_v59  ;;  %v366_v62 = vpop.f32.mrb[23].mxu0  ;;  %1384 = vmatpush3.bf16.msra.mxu1 %v1972_v63  ;;  %v464_v1 = vmax.f32 %v1606_v54, %v432_v56  ;;  %v1699_v54 = vld [vmem:[%s2140_s2 + $0xb4] ss:$8 sps:$4 sm:$0xff]  }
 0x155   :  { %v431_v0 = vmul.f32 0.01, %v366_v62  ;;  %1385 = vmatprep.subr.bf16.mxu1 %v483_v53  ;;  %v462_v3 = vmax.f32 %v363_v57, %v430_v58  ;;  %v1698_v53 = vld [vmem:[%s2140_s2 + $0xa0] ss:$8 sps:$4 sm:$0xff]   ;;  %v1702_v56 = vld [vmem:[%s2140_s2 + $0xc4] ss:$8 sps:$4 sm:$0xff]  }
 0x156   :  { %v465_v2 = vmax.f32 %v1607_v59, %v433_v60  ;;  %v1704_v57 = vld [vmem:[%s2140_s2 + $0xc0] ss:$8 sps:$4 sm:$0xff]   ;;  %v1705_v58 = vld [vmem:[%s2140_s2 + $0xd4] ss:$8 sps:$4 sm:$0xff]   ;;  %v1707_v59 = vld [vmem:[%s2140_s2 + $0xd0] ss:$8 sps:$4 sm:$0xff]  }
 0x157   :  { %v463_v4 = vmax.f32 %v366_v62, %v431_v0  ;;  %v1708_v60 = vld [vmem:[%s2140_s2 + $0xe4] ss:$8 sps:$4 sm:$0xff]   ;;  %v1710_v62 = vld [vmem:[%s2140_s2 + $0xe0] ss:$8 sps:$4 sm:$0xff]   ;;  %v1711_v0 = vld [vmem:[%s2140_s2 + $0xf4] ss:$8 sps:$4 sm:$0xff]  }
 0x158   :  { %v485_v5 = vpack.c.bf16 %v465_v2, %v464_v1  ;;  %1386 = vmatpush3.bf16.msra.mxu1 %v1970_v61  ;;  %v1713_v1 = vld [vmem:[%s2140_s2 + $0xf0] ss:$8 sps:$4 sm:$0xff]  }
 0x159   :  { %v484_v6 = vpack.c.bf16 %v463_v4, %v462_v3  ;;  %v1610_v7 = vpop.f32.mrb[24].mxu0 }
 0x15a   :  { %v436_v8 = vmul.f32 0.01, %v1610_v7  ;;  %v379_v9 = vpop.f32.mrb[25].mxu0 }
 0x15b   :  { %v434_v10 = vmul.f32 0.01, %v379_v9  ;;  %v1611_v13 = vpop.f32.mrb[26].mxu0  ;;  %1387 = vmatprep.subr.bf16.mxu1 %v484_v6 }
 0x15c   :  { %v437_v14 = vmul.f32 0.01, %v1611_v13  ;;  %v382_v15 = vpop.f32.mrb[27].mxu0  ;;  %1388 = vmatpush3.bf16.msra.mxu1 %v1976_v12  ;;  %v468_v16 = vmax.f32 %v1610_v7, %v436_v8 }
 0x15d   :  { %v435_v63 = vmul.f32 0.01, %v382_v15  ;;  %1389 = vmatprep.subr.bf16.mxu1 %v485_v5  ;;  %v466_v18 = vmax.f32 %v379_v9, %v434_v10  ;;  %v1716_v9 = vld [vmem:[#allocation4 + $0x4] ss:$8 sps:$4 sm:$0xff]  }
 0x15e   :  { %v469_v17 = vmax.f32 %v1611_v13, %v437_v14  ;;  %1115 = vmatprep.mubr.bf16.mxu0 %v1716_v9 }
 0x15f   :  { %v467_v19 = vmax.f32 %v382_v15, %v435_v63 }
 0x160   :  { %v487_v20 = vpack.c.bf16 %v469_v17, %v468_v16  ;;  %1390 = vmatpush3.bf16.msra.mxu1 %v1974_v11 }
 0x161   :  { %v486_v61 = vpack.c.bf16 %v467_v19, %v466_v18  ;;  %v1614_v21 = vpop.f32.mrb[28].mxu0 }
 0x162   :  { %v440_v22 = vmul.f32 0.01, %v1614_v21  ;;  %v395_v23 = vpop.f32.mrb[29].mxu0 }
 0x163   :  { %v438_v24 = vmul.f32 0.01, %v395_v23  ;;  %v1615_v27 = vpop.f32.mrb[30].mxu0  ;;  %1391 = vmatprep.subr.bf16.mxu1 %v486_v61 }
 0x164   :  { %v441_v28 = vmul.f32 0.01, %v1615_v27  ;;  %v398_v29 = vpop.f32.mrb[31].mxu0  ;;  %1392 = vmatpush3.bf16.msra.mxu1 %v1980_v26  ;;  %v472_v30 = vmax.f32 %v1614_v21, %v440_v22  ;;  %v1669_v26 = vld [vmem:[%s2140_s2 + $0x14] ss:$8 sps:$4 sm:$0xff]  }
 0x165   :  { %v439_v12 = vmul.f32 0.01, %v398_v29  ;;  %1393 = vmatprep.subr.bf16.mxu1 %v487_v20  ;;  %v470_v32 = vmax.f32 %v395_v23, %v438_v24 }
 0x166   :  { %v473_v31 = vmax.f32 %v1615_v27, %v441_v28 }
 0x167   :  { %v471_v33 = vmax.f32 %v398_v29, %v439_v12 }
 0x168   :  { %v489_v34 = vpack.c.bf16 %v473_v31, %v472_v30  ;;  %1394 = vmatpush3.bf16.msra.mxu1 %v1978_v25  ;;  %v1671_v25 = vld [vmem:[%s2140_s2 + $0x10] ss:$8 sps:$4 sm:$0xff]  }
 0x169   :  { %v488_v11 = vpack.c.bf16 %v471_v33, %v470_v32 }
 0x16b   :  { %1395 = vmatprep.subr.bf16.mxu1 %v488_v11 }
 0x16c   :  { %1396 = vmatpush3.bf16.msra.mxu1 %v1984_v40  ;;  %v1678_v40 = vld [vmem:[%s2140_s2 + $0x44] ss:$8 sps:$4 sm:$0xff]  }
 0x16d   :  { %1397 = vmatprep.subr.bf16.mxu1 %v489_v34 }
 0x170   :  { %1398 = vmatpush3.bf16.msra.mxu1 %v1982_v39  ;;  %v1677_v39 = vld [vmem:[%s2140_s2 + $0x30] ss:$8 sps:$4 sm:$0xff]  }
 0x173   :  { %747 = vmatmul.mubr.bf16.vlgmr.msra.gmra.mrb[0].mxu1 %v1666_v35 }
 0x174   :  { %754 = vmatprep.mubr.bf16.mxu1 %v1669_v26 }
 0x17b   :  { %755 = vmatmul.mubr.bf16.gmra.mrb[4].mxu1 %v1671_v25 }
 0x17c   :  { %762 = vmatprep.mubr.bf16.mxu1 %v1672_v36 }
 0x183   :  { %763 = vmatmul.mubr.bf16.gmra.mrb[8].mxu1 %v1674_v37 }
 0x184   :  { %770 = vmatprep.mubr.bf16.mxu1 %v1675_v38 }
 0x18b   :  { %771 = vmatmul.mubr.bf16.gmra.mrb[12].mxu1 %v1677_v39 }
 0x18c   :  { %778 = vmatprep.mubr.bf16.mxu1 %v1678_v40 }
 0x193   :  { %779 = vmatmul.mubr.bf16.gmra.mrb[16].mxu1 %v1680_v41 }
 0x194   :  { %786 = vmatprep.mubr.bf16.mxu1 %v1681_v42 }
 0x19b   :  { %787 = vmatmul.mubr.bf16.gmra.mrb[20].mxu1 %v1683_v43 }
 0x19c   :  { %794 = vmatprep.mubr.bf16.mxu1 %v1684_v44 }
 0x1a3   :  { %795 = vmatmul.mubr.bf16.gmra.mrb[24].mxu1 %v1686_v45 }
 0x1a4   :  { %802 = vmatprep.mubr.bf16.mxu1 %v1687_v46 }
 0x1ab   :  { %803 = vmatmul.mubr.bf16.gmra.mrb[28].mxu1 %v1689_v47 }
 0x1ac   :  { %810 = vmatprep.mubr.bf16.mxu1 %v1690_v48 }
 0x1b3   :  { %811 = vmatmul.mubr.bf16.gmra.mrb[32].mxu1 %v1692_v49 }
 0x1b4   :  { %818 = vmatprep.mubr.bf16.mxu1 %v1693_v50 }
 0x1bb   :  { %819 = vmatmul.mubr.bf16.gmra.mrb[36].mxu1 %v1695_v51 }
 0x1bc   :  { %826 = vmatprep.mubr.bf16.mxu1 %v1696_v52 }
 0x1c3   :  { %827 = vmatmul.mubr.bf16.gmra.mrb[40].mxu1 %v1698_v53 }
 0x1c4   :  { %834 = vmatprep.mubr.bf16.mxu1 %v1699_v54 }
 0x1cb   :  { %835 = vmatmul.mubr.bf16.gmra.mrb[44].mxu1 %v1701_v55 }
 0x1cc   :  { %842 = vmatprep.mubr.bf16.mxu1 %v1702_v56 }
 0x1d3   :  { %843 = vmatmul.mubr.bf16.gmra.mrb[48].mxu1 %v1704_v57 }
 0x1d4   :  { %850 = vmatprep.mubr.bf16.mxu1 %v1705_v58 }
 0x1db   :  { %851 = vmatmul.mubr.bf16.gmra.mrb[52].mxu1 %v1707_v59 }
 0x1dc   :  { %858 = vmatprep.mubr.bf16.mxu1 %v1708_v60 }
 0x1e3   :  { %859 = vmatmul.mubr.bf16.gmra.mrb[56].mxu1 %v1710_v62 }
 0x1e4   :  { %866 = vmatprep.mubr.bf16.mxu1 %v1711_v0 }
 0x1eb   :  { %867 = vmatmul.mubr.bf16.gmra.mrb[60].mxu1 %v1713_v1 }
 0x246   :  { %v1399_v2 = vpop.f32.mrb[0].mxu1 }
 0x247   :  { %v1400_v3 = vpop.f32.mrb[1].mxu1 }
 0x248   :  { %v1401_v4 = vadd.f32 %v1400_v3, %v1399_v2  ;;  %v1402_v5 = vpop.f32.mrb[2].mxu1 }
 0x249   :  { %v1403_v6 = vpop.f32.mrb[3].mxu1 }
 0x24a   :  { %v875_v7 = vmul.f32 0.01, %v1401_v4  ;;  %v1404_v8 = vadd.f32 %v1403_v6, %v1402_v5 }
 0x24c   :  { %v876_v10 = vmul.f32 0.01, %v1404_v8  ;;  %v907_v13 = vmax.f32 %v1401_v4, %v875_v7 }
 0x24e   :  { %v908_v14 = vmax.f32 %v1404_v8, %v876_v10  ;;  %v1405_v15 = vpop.f32.mrb[4].mxu1 }
 0x24f   :  { %v1406_v63 = vpop.f32.mrb[5].mxu1 }
 0x250   :  { %v2087_v16 = vpack.c.bf16 %v908_v14, %v907_v13  ;;  %v1407_v17 = vadd.f32 %v1406_v63, %v1405_v15  ;;  %v1408_v18 = vpop.f32.mrb[6].mxu1 }
 0x251   :  { %v1409_v19 = vpop.f32.mrb[7].mxu1 }
 0x252   :  { %v877_v20 = vmul.f32 0.01, %v1407_v17  ;;  %v1410_v61 = vadd.f32 %v1409_v19, %v1408_v18 }
 0x254   :  { %v878_v21 = vmul.f32 0.01, %v1410_v61  ;;  %v909_v22 = vmax.f32 %v1407_v17, %v877_v20 }
 0x256   :  { %v910_v23 = vmax.f32 %v1410_v61, %v878_v21  ;;  %v1411_v24 = vpop.f32.mrb[8].mxu1 }
 0x257   :  { %v1412_v27 = vpop.f32.mrb[9].mxu1 }
 0x258   :  { %v2089_v28 = vpack.c.bf16 %v910_v23, %v909_v22  ;;  %v1413_v29 = vadd.f32 %v1412_v27, %v1411_v24  ;;  %v1414_v12 = vpop.f32.mrb[10].mxu1 }
 0x259   :  { %v1415_v30 = vpop.f32.mrb[11].mxu1 }
 0x25a   :  { %v879_v31 = vmul.f32 0.01, %v1413_v29  ;;  %v1416_v32 = vadd.f32 %v1415_v30, %v1414_v12 }
 0x25c   :  { %v880_v33 = vmul.f32 0.01, %v1416_v32  ;;  %v911_v34 = vmax.f32 %v1413_v29, %v879_v31 }
 0x25e   :  { %v912_v11 = vmax.f32 %v1416_v32, %v880_v33  ;;  %v1417_v35 = vpop.f32.mrb[12].mxu1 }
 0x25f   :  { %v1418_v26 = vpop.f32.mrb[13].mxu1 }
 0x260   :  { %v2091_v25 = vpack.c.bf16 %v912_v11, %v911_v34  ;;  %v1419_v36 = vadd.f32 %v1418_v26, %v1417_v35  ;;  %v1420_v37 = vpop.f32.mrb[14].mxu1 }
 0x261   :  { %v1421_v38 = vpop.f32.mrb[15].mxu1 }
 0x262   :  { %v881_v39 = vmul.f32 0.01, %v1419_v36  ;;  %v1422_v40 = vadd.f32 %v1421_v38, %v1420_v37 }
 0x264   :  { %v882_v41 = vmul.f32 0.01, %v1422_v40  ;;  %v913_v42 = vmax.f32 %v1419_v36, %v881_v39 }
 0x266   :  { %v914_v43 = vmax.f32 %v1422_v40, %v882_v41  ;;  %v1423_v44 = vpop.f32.mrb[16].mxu1 }
 0x267   :  { %v1424_v45 = vpop.f32.mrb[17].mxu1 }
 0x268   :  { %v2093_v46 = vpack.c.bf16 %v914_v43, %v913_v42  ;;  %v1425_v47 = vadd.f32 %v1424_v45, %v1423_v44  ;;  %v1426_v48 = vpop.f32.mrb[18].mxu1 }
 0x269   :  { %v1427_v49 = vpop.f32.mrb[19].mxu1 }
 0x26a   :  { %v883_v50 = vmul.f32 0.01, %v1425_v47  ;;  %v1428_v51 = vadd.f32 %v1427_v49, %v1426_v48 }
 0x26c   :  { %v884_v52 = vmul.f32 0.01, %v1428_v51  ;;  %v915_v53 = vmax.f32 %v1425_v47, %v883_v50 }
 0x26e   :  { %v916_v54 = vmax.f32 %v1428_v51, %v884_v52  ;;  %v1429_v55 = vpop.f32.mrb[20].mxu1 }
 0x26f   :  { %v1430_v56 = vpop.f32.mrb[21].mxu1 }
 0x270   :  { %v2095_v57 = vpack.c.bf16 %v916_v54, %v915_v53  ;;  %v1431_v58 = vadd.f32 %v1430_v56, %v1429_v55  ;;  %v1432_v59 = vpop.f32.mrb[22].mxu1 }
 0x271   :  { %v1433_v60 = vpop.f32.mrb[23].mxu1 }
 0x272   :  { %v885_v62 = vmul.f32 0.01, %v1431_v58  ;;  %v1434_v0 = vadd.f32 %v1433_v60, %v1432_v59 }
 0x274   :  { %v886_v1 = vmul.f32 0.01, %v1434_v0  ;;  %v917_v2 = vmax.f32 %v1431_v58, %v885_v62 }
 0x276   :  { %v918_v3 = vmax.f32 %v1434_v0, %v886_v1  ;;  %v1435_v4 = vpop.f32.mrb[24].mxu1 }
 0x277   :  { %v1436_v5 = vpop.f32.mrb[25].mxu1 }
 0x278   :  { %v2097_v6 = vpack.c.bf16 %v918_v3, %v917_v2  ;;  %v1437_v7 = vadd.f32 %v1436_v5, %v1435_v4  ;;  %v1438_v8 = vpop.f32.mrb[26].mxu1 }
 0x279   :  { %v1439_v9 = vpop.f32.mrb[27].mxu1 }
 0x27a   :  { %v887_v10 = vmul.f32 0.01, %v1437_v7  ;;  %v1440_v13 = vadd.f32 %v1439_v9, %v1438_v8 }
 0x27c   :  { %v888_v14 = vmul.f32 0.01, %v1440_v13  ;;  %v919_v15 = vmax.f32 %v1437_v7, %v887_v10 }
 0x27e   :  { %v920_v63 = vmax.f32 %v1440_v13, %v888_v14  ;;  %v1441_v17 = vpop.f32.mrb[28].mxu1 }
 0x27f   :  { %v1442_v18 = vpop.f32.mrb[29].mxu1 }
 0x280   :  { %v2099_v19 = vpack.c.bf16 %v920_v63, %v919_v15  ;;  %v1443_v20 = vadd.f32 %v1442_v18, %v1441_v17  ;;  %v1444_v61 = vpop.f32.mrb[30].mxu1 }
 0x281   :  { %v1445_v21 = vpop.f32.mrb[31].mxu1 }
 0x282   :  { %v889_v22 = vmul.f32 0.01, %v1443_v20  ;;  %v1446_v23 = vadd.f32 %v1445_v21, %v1444_v61 }
 0x284   :  { %v890_v24 = vmul.f32 0.01, %v1446_v23  ;;  %v921_v27 = vmax.f32 %v1443_v20, %v889_v22 }
 0x286   :  { %v922_v29 = vmax.f32 %v1446_v23, %v890_v24  ;;  %v1447_v12 = vpop.f32.mrb[32].mxu1 }
 0x287   :  { %v1448_v30 = vpop.f32.mrb[33].mxu1 }
 0x288   :  { %v2101_v31 = vpack.c.bf16 %v922_v29, %v921_v27  ;;  %v1449_v32 = vadd.f32 %v1448_v30, %v1447_v12  ;;  %v1450_v33 = vpop.f32.mrb[34].mxu1 }
 0x289   :  { %v1451_v34 = vpop.f32.mrb[35].mxu1 }
 0x28a   :  { %v891_v11 = vmul.f32 0.01, %v1449_v32  ;;  %v1452_v35 = vadd.f32 %v1451_v34, %v1450_v33 }
 0x28c   :  { %v892_v26 = vmul.f32 0.01, %v1452_v35  ;;  %v923_v36 = vmax.f32 %v1449_v32, %v891_v11 }
 0x28e   :  { %v924_v37 = vmax.f32 %v1452_v35, %v892_v26  ;;  %v1453_v38 = vpop.f32.mrb[36].mxu1 }
 0x28f   :  { %v1454_v39 = vpop.f32.mrb[37].mxu1 }
 0x290   :  { %v1455_v40 = vadd.f32 %v1454_v39, %v1453_v38  ;;  %v1456_v41 = vpop.f32.mrb[38].mxu1  ;;  %v947_v42 = vpack.c.bf16 %v924_v37, %v923_v36 }
 0x291   :  { %v1457_v43 = vpop.f32.mrb[39].mxu1 }
 0x292   :  { %v893_v44 = vmul.f32 0.01, %v1455_v40  ;;  %v1458_v45 = vadd.f32 %v1457_v43, %v1456_v41  ;;  %1495 = vmatprep.subr.bf16.mxu0 %v947_v42 }
 0x293   :  { %1496 = vmatpush3.bf16.msra.mxu0 %v2087_v16 }
 0x294   :  { %v894_v47 = vmul.f32 0.01, %v1458_v45  ;;  %v925_v48 = vmax.f32 %v1455_v40, %v893_v44 }
 0x296   :  { %v926_v49 = vmax.f32 %v1458_v45, %v894_v47  ;;  %v1459_v50 = vpop.f32.mrb[40].mxu1 }
 0x297   :  { %v1460_v51 = vpop.f32.mrb[41].mxu1 }
 0x298   :  { %v1461_v52 = vadd.f32 %v1460_v51, %v1459_v50  ;;  %v1462_v53 = vpop.f32.mrb[42].mxu1  ;;  %v948_v54 = vpack.c.bf16 %v926_v49, %v925_v48 }
 0x299   :  { %v1463_v55 = vpop.f32.mrb[43].mxu1 }
 0x29a   :  { %v895_v56 = vmul.f32 0.01, %v1461_v52  ;;  %v1464_v58 = vadd.f32 %v1463_v55, %v1462_v53  ;;  %1497 = vmatprep.subr.bf16.mxu0 %v948_v54 }
 0x29b   :  { %1498 = vmatpush3.bf16.msra.mxu0 %v2089_v28 }
 0x29c   :  { %v896_v59 = vmul.f32 0.01, %v1464_v58  ;;  %v927_v60 = vmax.f32 %v1461_v52, %v895_v56  ;;  %v1717_v56 = vld [vmem:[#allocation4 + $0x14] ss:$8 sps:$4 sm:$0xff]  }
 0x29e   :  { %v928_v62 = vmax.f32 %v1464_v58, %v896_v59  ;;  %v1465_v0 = vpop.f32.mrb[44].mxu1  ;;  %v1719_v58 = vld [vmem:[#allocation4 + $0x10] ss:$8 sps:$4 sm:$0xff]   ;;  %v1720_v59 = vld [vmem:[#allocation4 + $0x24] ss:$8 sps:$4 sm:$0xff]  }
 0x29f   :  { %v1466_v1 = vpop.f32.mrb[45].mxu1 }
 0x2a0   :  { %v1467_v16 = vadd.f32 %v1466_v1, %v1465_v0  ;;  %v1468_v2 = vpop.f32.mrb[46].mxu1  ;;  %v949_v3 = vpack.c.bf16 %v928_v62, %v927_v60  ;;  %v1722_v60 = vld [vmem:[#allocation4 + $0x20] ss:$8 sps:$4 sm:$0xff]   ;;  %v1723_v62 = vld [vmem:[#allocation4 + $0x34] ss:$8 sps:$4 sm:$0xff]  }
 0x2a1   :  { %v1469_v4 = vpop.f32.mrb[47].mxu1  ;;  %v1726_v0 = vld [vmem:[#allocation4 + $0x44] ss:$8 sps:$4 sm:$0xff]   ;;  %v1728_v1 = vld [vmem:[#allocation4 + $0x40] ss:$8 sps:$4 sm:$0xff]  }
 0x2a2   :  { %v897_v5 = vmul.f32 0.01, %v1467_v16  ;;  %v1470_v7 = vadd.f32 %v1469_v4, %v1468_v2  ;;  %1499 = vmatprep.subr.bf16.mxu0 %v949_v3  ;;  %v1732_v2 = vld [vmem:[#allocation4 + $0x64] ss:$8 sps:$4 sm:$0xff]   ;;  %v1734_v3 = vld [vmem:[#allocation4 + $0x60] ss:$8 sps:$4 sm:$0xff]  }
 0x2a3   :  { %1500 = vmatpush3.bf16.msra.mxu0 %v2091_v25  ;;  %v1735_v4 = vld [vmem:[#allocation4 + $0x74] ss:$8 sps:$4 sm:$0xff]  }
 0x2a4   :  { %v898_v8 = vmul.f32 0.01, %v1470_v7  ;;  %v929_v9 = vmax.f32 %v1467_v16, %v897_v5  ;;  %v1729_v16 = vld [vmem:[#allocation4 + $0x54] ss:$8 sps:$4 sm:$0xff]   ;;  %v1737_v5 = vld [vmem:[#allocation4 + $0x70] ss:$8 sps:$4 sm:$0xff]  }
 0x2a6   :  { %v930_v10 = vmax.f32 %v1470_v7, %v898_v8  ;;  %v1471_v13 = vpop.f32.mrb[48].mxu1  ;;  %v1789_v7 = vmov 0.0  }
 0x2a7   :  { %v1472_v14 = vpop.f32.mrb[49].mxu1  ;;  %1616 = vmatprep.subr.bf16.mxu1 %v1789_v7  ;;  %1632 = vmatprep.mubr.msk.bf16.mxu1 %vm1790_vm1, %v1789_v7 }
 0x2a8   :  { %v1473_v28 = vadd.f32 %v1472_v14, %v1471_v13  ;;  %v1474_v15 = vpop.f32.mrb[50].mxu1  ;;  %v950_v63 = vpack.c.bf16 %v930_v10, %v929_v9 }
 0x2a9   :  { %v1475_v17 = vpop.f32.mrb[51].mxu1 }
 0x2aa   :  { %v899_v18 = vmul.f32 0.01, %v1473_v28  ;;  %v1476_v20 = vadd.f32 %v1475_v17, %v1474_v15  ;;  %1501 = vmatprep.subr.bf16.mxu0 %v950_v63 }
 0x2ab   :  { %1502 = vmatpush3.bf16.msra.mxu0 %v2093_v46 }
 0x2ac   :  { %v900_v61 = vmul.f32 0.01, %v1476_v20  ;;  %v931_v21 = vmax.f32 %v1473_v28, %v899_v18 }
 0x2ae   :  { %v932_v22 = vmax.f32 %v1476_v20, %v900_v61  ;;  %v1477_v23 = vpop.f32.mrb[52].mxu1 }
 0x2af   :  { %v1478_v24 = vpop.f32.mrb[53].mxu1 }
 0x2b0   :  { %v1479_v25 = vadd.f32 %v1478_v24, %v1477_v23  ;;  %v1480_v27 = vpop.f32.mrb[54].mxu1  ;;  %v951_v29 = vpack.c.bf16 %v932_v22, %v931_v21 }
 0x2b1   :  { %v1481_v12 = vpop.f32.mrb[55].mxu1 }
 0x2b2   :  { %v901_v30 = vmul.f32 0.01, %v1479_v25  ;;  %v1482_v32 = vadd.f32 %v1481_v12, %v1480_v27  ;;  %1503 = vmatprep.subr.bf16.mxu0 %v951_v29 }
 0x2b3   :  { %1504 = vmatpush3.bf16.msra.mxu0 %v2095_v57 }
 0x2b4   :  { %v902_v33 = vmul.f32 0.01, %v1482_v32  ;;  %v933_v34 = vmax.f32 %v1479_v25, %v901_v30 }
 0x2b6   :  { %v934_v11 = vmax.f32 %v1482_v32, %v902_v33  ;;  %v1483_v35 = vpop.f32.mrb[56].mxu1 }
 0x2b7   :  { %v1484_v26 = vpop.f32.mrb[57].mxu1 }
 0x2b8   :  { %v1485_v46 = vadd.f32 %v1484_v26, %v1483_v35  ;;  %v1486_v36 = vpop.f32.mrb[58].mxu1  ;;  %v952_v37 = vpack.c.bf16 %v934_v11, %v933_v34 }
 0x2b9   :  { %v1487_v38 = vpop.f32.mrb[59].mxu1 }
 0x2ba   :  { %v903_v39 = vmul.f32 0.01, %v1485_v46  ;;  %v1488_v40 = vadd.f32 %v1487_v38, %v1486_v36  ;;  %1505 = vmatprep.subr.bf16.mxu0 %v952_v37 }
 0x2bb   :  { %1506 = vmatpush3.bf16.msra.mxu0 %v2097_v6  ;;  %v1714_v6 = vld [vmem:[#allocation4] ss:$8 sps:$4 sm:$0xff]  }
 0x2bc   :  { %v904_v41 = vmul.f32 0.01, %v1488_v40  ;;  %v935_v42 = vmax.f32 %v1485_v46, %v903_v39 }
 0x2be   :  { %v936_v43 = vmax.f32 %v1488_v40, %v904_v41  ;;  %v1489_v44 = vpop.f32.mrb[60].mxu1 }
 0x2bf   :  { %v1490_v45 = vpop.f32.mrb[61].mxu1 }
 0x2c0   :  { %v1491_v57 = vadd.f32 %v1490_v45, %v1489_v44  ;;  %v1492_v47 = vpop.f32.mrb[62].mxu1  ;;  %v953_v48 = vpack.c.bf16 %v936_v43, %v935_v42 }
 0x2c1   :  { %v1493_v49 = vpop.f32.mrb[63].mxu1 }
 0x2c2   :  { %v905_v50 = vmul.f32 0.01, %v1491_v57  ;;  %v1494_v51 = vadd.f32 %v1493_v49, %v1492_v47  ;;  %1507 = vmatprep.subr.bf16.mxu0 %v953_v48 }
 0x2c3   :  { %1508 = vmatpush3.bf16.msra.mxu0 %v2099_v19  ;;  %v1725_v19 = vld [vmem:[#allocation4 + $0x30] ss:$8 sps:$4 sm:$0xff]  }
 0x2c4   :  { %v906_v52 = vmul.f32 0.01, %v1494_v51  ;;  %v937_v53 = vmax.f32 %v1491_v57, %v905_v50 }
 0x2c6   :  { %v938_v54 = vmax.f32 %v1494_v51, %v906_v52 }
 0x2c8   :  { %v954_v55 = vpack.c.bf16 %v938_v54, %v937_v53 }
 0x2ca   :  { %1509 = vmatprep.subr.bf16.mxu0 %v954_v55 }
 0x2cb   :  { %1510 = vmatpush3.bf16.msra.mxu0 %v2101_v31  ;;  %v1731_v31 = vld [vmem:[#allocation4 + $0x50] ss:$8 sps:$4 sm:$0xff]  }
 0x2ce   :  { %1116 = vmatmul.mubr.bf16.vlgmr.msra.gmra.mrb[32].mxu0 %v1714_v6 }
 0x2cf   :  { %1123 = vmatprep.mubr.bf16.mxu0 %v1717_v56 }
 0x2d6   :  { %1124 = vmatmul.mubr.bf16.gmra.mrb[36].mxu0 %v1719_v58 }
 0x2d7   :  { %1131 = vmatprep.mubr.bf16.mxu0 %v1720_v59 }
 0x2de   :  { %1132 = vmatmul.mubr.bf16.gmra.mrb[40].mxu0 %v1722_v60 }
 0x2df   :  { %1139 = vmatprep.mubr.bf16.mxu0 %v1723_v62 }
 0x2e6   :  { %1140 = vmatmul.mubr.bf16.gmra.mrb[44].mxu0 %v1725_v19 }
 0x2e7   :  { %1147 = vmatprep.mubr.bf16.mxu0 %v1726_v0 }
 0x2ee   :  { %1148 = vmatmul.mubr.bf16.gmra.mrb[48].mxu0 %v1728_v1 }
 0x2ef   :  { %1155 = vmatprep.mubr.bf16.mxu0 %v1729_v16 }
 0x2f6   :  { %1156 = vmatmul.mubr.bf16.gmra.mrb[52].mxu0 %v1731_v31 }
 0x2f7   :  { %1163 = vmatprep.mubr.bf16.mxu0 %v1732_v2 }
 0x2fe   :  { %1164 = vmatmul.mubr.bf16.gmra.mrb[56].mxu0 %v1734_v3 }
 0x2ff   :  { %1171 = vmatprep.mubr.bf16.mxu0 %v1735_v4 }
 0x306   :  { %1172 = vmatmul.mubr.bf16.gmra.mrb[60].mxu0 %v1737_v5 }
 0x3a1   :  { %v1511_v8 = vpop.f32.mrb[32].mxu0 }
 0x3a2   :  { %v1512_v9 = vpop.f32.mrb[33].mxu0 }
 0x3a3   :  { %v1513_v10 = vadd.f32 %v1512_v9, %v1511_v8  ;;  %v1514_v13 = vpop.f32.mrb[34].mxu0 }
 0x3a4   :  { %v1515_v14 = vpop.f32.mrb[35].mxu0 }
 0x3a5   :  { %v1180_v28 = vmul.f32 0.01, %v1513_v10  ;;  %v1516_v15 = vadd.f32 %v1515_v14, %v1514_v13 }
 0x3a7   :  { %v1181_v63 = vmul.f32 0.01, %v1516_v15  ;;  %v1196_v17 = vmax.f32 %v1513_v10, %v1180_v28 }
 0x3a9   :  { %v1197_v18 = vmax.f32 %v1516_v15, %v1181_v63  ;;  %v1517_v20 = vpop.f32.mrb[36].mxu0 }
 0x3aa   :  { %v1518_v61 = vpop.f32.mrb[37].mxu0 }
 0x3ab   :  { %v1212_v21 = vpack.c.bf16 %v1197_v18, %v1196_v17  ;;  %v1519_v22 = vadd.f32 %v1518_v61, %v1517_v20  ;;  %v1520_v23 = vpop.f32.mrb[38].mxu0 }
 0x3ac   :  { %v1521_v24 = vpop.f32.mrb[39].mxu0 }
 0x3ad   :  { %v1182_v25 = vmul.f32 0.01, %v1519_v22  ;;  %1617 = vmatpush3.bf16.msra.mxu1 %v1212_v21  ;;  %v1522_v27 = vadd.f32 %v1521_v24, %v1520_v23 }
 0x3ae   :  { %1618 = vmatprep.subr.bf16.mxu1 %v1789_v7 }
 0x3af   :  { %v1183_v29 = vmul.f32 0.01, %v1522_v27  ;;  %v1198_v12 = vmax.f32 %v1519_v22, %v1182_v25 }
 0x3b1   :  { %v1199_v30 = vmax.f32 %v1522_v27, %v1183_v29  ;;  %v1523_v32 = vpop.f32.mrb[40].mxu0 }
 0x3b2   :  { %v1524_v33 = vpop.f32.mrb[41].mxu0 }
 0x3b3   :  { %v1213_v34 = vpack.c.bf16 %v1199_v30, %v1198_v12  ;;  %v1525_v11 = vadd.f32 %v1524_v33, %v1523_v32  ;;  %v1526_v35 = vpop.f32.mrb[42].mxu0 }
 0x3b4   :  { %v1527_v26 = vpop.f32.mrb[43].mxu0 }
 0x3b5   :  { %1619 = vmatpush3.bf16.msra.mxu1 %v1213_v34  ;;  %v1184_v46 = vmul.f32 0.01, %v1525_v11  ;;  %v1528_v36 = vadd.f32 %v1527_v26, %v1526_v35  ;;  %v1220_v35 = vld [vmem:[%s2142_s4] sm:$0x1]  ;;  %v1222_v26 = vstv %s2143_s5 }
 0x3b6   :  { %1620 = vmatprep.subr.bf16.mxu1 %v1789_v7 }
 0x3b7   :  { %v1185_v37 = vmul.f32 0.01, %v1528_v36  ;;  %v1200_v38 = vmax.f32 %v1525_v11, %v1184_v46 }
 0x3b9   :  { %v1201_v39 = vmax.f32 %v1528_v36, %v1185_v37  ;;  %v1529_v40 = vpop.f32.mrb[44].mxu0 }
 0x3ba   :  { %v1530_v41 = vpop.f32.mrb[45].mxu0 }
 0x3bb   :  { %v1214_v42 = vpack.c.bf16 %v1201_v39, %v1200_v38  ;;  %v1531_v43 = vadd.f32 %v1530_v41, %v1529_v40  ;;  %v1532_v44 = vpop.f32.mrb[46].mxu0 }
 0x3bc   :  { %v1533_v45 = vpop.f32.mrb[47].mxu0 }
 0x3bd   :  { %1621 = vmatpush3.bf16.msra.mxu1 %v1214_v42  ;;  %v1186_v57 = vmul.f32 0.01, %v1531_v43  ;;  %v1534_v47 = vadd.f32 %v1533_v45, %v1532_v44 }
 0x3be   :  { %1622 = vmatprep.subr.bf16.mxu1 %v1789_v7 }
 0x3bf   :  { %v1187_v48 = vmul.f32 0.01, %v1534_v47  ;;  %v1202_v49 = vmax.f32 %v1531_v43, %v1186_v57 }
 0x3c1   :  { %v1203_v50 = vmax.f32 %v1534_v47, %v1187_v48  ;;  %v1535_v51 = vpop.f32.mrb[48].mxu0 }
 0x3c2   :  { %v1536_v52 = vpop.f32.mrb[49].mxu0 }
 0x3c3   :  { %v1215_v53 = vpack.c.bf16 %v1203_v50, %v1202_v49  ;;  %v1537_v54 = vadd.f32 %v1536_v52, %v1535_v51  ;;  %v1538_v55 = vpop.f32.mrb[50].mxu0 }
 0x3c4   :  { %v1539_v6 = vpop.f32.mrb[51].mxu0 }
 0x3c5   :  { %1623 = vmatpush3.bf16.msra.mxu1 %v1215_v53  ;;  %v1188_v56 = vmul.f32 0.01, %v1537_v54  ;;  %v1540_v58 = vadd.f32 %v1539_v6, %v1538_v55 }
 0x3c6   :  { %1624 = vmatprep.subr.bf16.mxu1 %v1789_v7 }
 0x3c7   :  { %v1189_v59 = vmul.f32 0.01, %v1540_v58  ;;  %v1204_v60 = vmax.f32 %v1537_v54, %v1188_v56 }
 0x3c9   :  { %v1205_v62 = vmax.f32 %v1540_v58, %v1189_v59  ;;  %v1541_v19 = vpop.f32.mrb[52].mxu0 }
 0x3ca   :  { %v1542_v0 = vpop.f32.mrb[53].mxu0 }
 0x3cb   :  { %v1216_v1 = vpack.c.bf16 %v1205_v62, %v1204_v60  ;;  %v1543_v16 = vadd.f32 %v1542_v0, %v1541_v19  ;;  %v1544_v31 = vpop.f32.mrb[54].mxu0 }
 0x3cc   :  { %v1545_v2 = vpop.f32.mrb[55].mxu0 }
 0x3cd   :  { %1625 = vmatpush3.bf16.msra.mxu1 %v1216_v1  ;;  %v1190_v3 = vmul.f32 0.01, %v1543_v16  ;;  %v1546_v4 = vadd.f32 %v1545_v2, %v1544_v31 }
 0x3ce   :  { %1626 = vmatprep.subr.bf16.mxu1 %v1789_v7 }
 0x3cf   :  { %v1191_v5 = vmul.f32 0.01, %v1546_v4  ;;  %v1206_v8 = vmax.f32 %v1543_v16, %v1190_v3 }
 0x3d1   :  { %v1207_v9 = vmax.f32 %v1546_v4, %v1191_v5  ;;  %v1547_v10 = vpop.f32.mrb[56].mxu0 }
 0x3d2   :  { %v1548_v13 = vpop.f32.mrb[57].mxu0 }
 0x3d3   :  { %v1217_v14 = vpack.c.bf16 %v1207_v9, %v1206_v8  ;;  %v1549_v28 = vadd.f32 %v1548_v13, %v1547_v10  ;;  %v1550_v15 = vpop.f32.mrb[58].mxu0 }
 0x3d4   :  { %v1551_v63 = vpop.f32.mrb[59].mxu0 }
 0x3d5   :  { %1627 = vmatpush3.bf16.msra.mxu1 %v1217_v14  ;;  %v1192_v17 = vmul.f32 0.01, %v1549_v28  ;;  %v1552_v18 = vadd.f32 %v1551_v63, %v1550_v15 }
 0x3d6   :  { %1628 = vmatprep.subr.bf16.mxu1 %v1789_v7 }
 0x3d7   :  { %v1193_v20 = vmul.f32 0.01, %v1552_v18  ;;  %v1208_v61 = vmax.f32 %v1549_v28, %v1192_v17 }
 0x3d9   :  { %v1209_v21 = vmax.f32 %v1552_v18, %v1193_v20  ;;  %v1553_v22 = vpop.f32.mrb[60].mxu0 }
 0x3da   :  { %v1554_v23 = vpop.f32.mrb[61].mxu0 }
 0x3db   :  { %v1218_v24 = vpack.c.bf16 %v1209_v21, %v1208_v61  ;;  %v1555_v25 = vadd.f32 %v1554_v23, %v1553_v22  ;;  %v1556_v27 = vpop.f32.mrb[62].mxu0 }
 0x3dc   :  { %v1557_v29 = vpop.f32.mrb[63].mxu0 }
 0x3dd   :  { %1629 = vmatpush3.bf16.msra.mxu1 %v1218_v24  ;;  %v1194_v12 = vmul.f32 0.01, %v1555_v25  ;;  %v1558_v30 = vadd.f32 %v1557_v29, %v1556_v27 }
 0x3de   :  { %1630 = vmatprep.subr.bf16.mxu1 %v1789_v7 }
 0x3df   :  { %v1195_v32 = vmul.f32 0.01, %v1558_v30  ;;  %v1210_v33 = vmax.f32 %v1555_v25, %v1194_v12 }
 0x3e1   :  { %v1211_v34 = vmax.f32 %v1558_v30, %v1195_v32 }
 0x3e3   :  { %v1219_v11 = vpack.c.bf16 %v1211_v34, %v1210_v33 }
 0x3e5   :  { %1631 = vmatpush3.bf16.msra.mxu1 %v1219_v11 }
 0x3e8   :  { %1633 = vmatmul.mubr.bf16.vlgmr.msra.gmra.mrb[64].mxu1 %v1220_v35 }
 0x4bb   :  { %v1257_v46 = vpop.f32.mrb[64].mxu1 }
 0x4bc   :  { %v1258_v36 = vadd.f32 %v1257_v46, %v1222_v26  ;;  %v1634_v37 = vpop.f32.mrb[65].mxu1 }
 0x4bd   :  { %v1260_v7 = vpop.f32.mrb[66].mxu1 }
 0x4be   :  { %1263 = vst [vmem:[#allocation7] sm:$0x1] %v1258_v36  ;;  %v1635_v38 = vpop.f32.mrb[67].mxu1 }
 0x4bf   :  { %1771 = shalt.err (!%p1768_p12)
}
 0x4c0   :  { %s1772_s5 = scalar_lea.hbm %s2144_s6, 16 }
 0x4c1   :  { %p1773_p13 = scmp.ne.s32.totalorder %s2144_s6, %s1772_s5  ;;  %p1776_p0 = scmp.lt.u32.totalorder %s1772_s5, %s2144_s6 }
 0x4c3   :  { %p1778_p1 = pnand %p1776_p0, %p1773_p13 }
 0x4c5   :  { %1781 = shalt.err (!%p1778_p1)
}
 0x4c6   :  { %1273 = dma.vmem_to_hbm [thread:$0]  %s1271_s11, 16, %s2144_s6, [#allocation6]  }
 0x4c7   :  { %1784 = dma.done.wait [#allocation6], 16  }
 0x4c8   :  { %1785 = vsyncadd [#allocation6], 4294967280 }
 0x4c9   :  { %1277 = vsyncpa [#allocation5], 1 }
 0x4ca   :  { %1278 = vsyncpa [#allocation6], 1 }

</bundles_post_ra>
